<compile_context>
chip_gen: v5e
topology: v5e:2x2
jax: 0.10.0
libtpu: 0.0.40
codegen_flags: <defaults>
</compile_context>

<pallas_src>
import jax
import jax.numpy as jnp
from jax import lax
from jax.experimental import pallas as pl
from jax.experimental.pallas import tpu as pltpu


def _round_up(v, m):
    return ((v + m - 1) // m) * m


def _cdiv(a, b):
    return -(-a // b)


def _linear_kernel(x_ref, w_ref, b_ref, o_ref):
    # x_ref: (TILE_N, K), w_ref: (K, O), b_ref: (1, O), o_ref: (TILE_N, O)
    # MXU-native contraction (plain x @ W on the pre-transposed weight), f32 acc.
    acc = lax.dot_general(
        x_ref[...],
        w_ref[...],
        dimension_numbers=(((1,), (0,)), ((), ())),
        preferred_element_type=jnp.float32,
    )
    # Broadcasted bias add on the VPU; store at the real output width (masked
    # vst for out_f < 128 is far cheaper than 128x writeback amplification).
    o_ref[...] = (acc + b_ref[...].astype(jnp.float32)).astype(o_ref.dtype)


def linear_forward(x, weight, bias, *, tile_n=1024):
    """x: (N, in_features); weight: (out_features, in_features); bias: (out_features,)."""
    n, in_f = x.shape
    out_f = weight.shape[0]

    # Row tile: multiple of 8 (sublane); aim for >= 2 balanced blocks so v7x's
    # two TensorCores both get work, capped at `tile_n` rows for large N.
    if n <= 8:
        tn = 8
    else:
        tn = min(_round_up(tile_n, 8), _round_up(_cdiv(n, 2), 8))
    grid_n = _cdiv(n, tn)  # ragged last block is masked by Pallas

    # One-time tiny wrapper transforms (no HBM padding of x or the output).
    w_t = jnp.transpose(weight)       # (in_f, out_f): MXU-native x @ W
    b_2d = bias.reshape(1, out_f)     # lane-oriented bias row

    itemsize = jnp.dtype(x.dtype).itemsize
    bytes_accessed = itemsize * (x.size + w_t.size + b_2d.size + n * out_f)

    out = pl.pallas_call(
        _linear_kernel,
        out_shape=jax.ShapeDtypeStruct((n, out_f), x.dtype),
        grid_spec=pltpu.PrefetchScalarGridSpec(
            num_scalar_prefetch=0,
            grid=(grid_n,),
            in_specs=[
                # x: tiled along rows; last dim equals the full array dim.
                pl.BlockSpec((tn, in_f), lambda i: (i, 0)),
                # weight: constant index_map -> VMEM-resident across steps.
                pl.BlockSpec((in_f, out_f), lambda i: (0, 0)),
                # bias: constant index_map, single row.
                pl.BlockSpec((1, out_f), lambda i: (0, 0)),
            ],
            out_specs=pl.BlockSpec((tn, out_f), lambda i: (i, 0)),
        ),
        compiler_params=pltpu.CompilerParams(
            dimension_semantics=("parallel",),
        ),
        cost_estimate=pl.CostEstimate(
            flops=2 * n * in_f * out_f,
            transcendentals=0,
            bytes_accessed=bytes_accessed,
        ),
    )(x, w_t, b_2d)
    return out


if __name__ == "__main__":
    input_size = 10
    output_size = 1
    num_samples = 100

    key = jax.random.PRNGKey(0)
    kx, kw, kb = jax.random.split(key, 3)

    # Example input, consistent with torch.randn(num_samples, input_size)
    x = jax.random.normal(kx, (num_samples, input_size), dtype=jnp.float32)

    # Deterministic parameter init mimicking nn.Linear: U(-1/sqrt(fan_in), 1/sqrt(fan_in))
    bound = 1.0 / (input_size ** 0.5)
    weight = jax.random.uniform(
        kw, (output_size, input_size), minval=-bound, maxval=bound, dtype=jnp.float32
    )
    bias = jax.random.uniform(
        kb, (output_size,), minval=-bound, maxval=bound, dtype=jnp.float32
    )

    y = linear_forward(x, weight, bias)
    jax.block_until_ready(y)

    # Pure-JAX reference check
    y_ref = x @ weight.T + bias
    assert y.shape == (num_samples, output_size)
    assert jnp.allclose(y, y_ref, atol=1e-5, rtol=1e-5)

    print("KERNEL_OK")
</pallas_src>

<mosaic_0001>
module attributes {stable_mosaic.version = 11 : i64} {
  func.func @_linear_kernel(%arg0: i32, %arg1: memref<56x10xf32, #tpu.memory_space<vmem>>, %arg2: memref<10x1xf32, #tpu.memory_space<vmem>>, %arg3: memref<1x1xf32, #tpu.memory_space<vmem>>, %arg4: memref<56x1xf32, #tpu.memory_space<vmem>>) attributes {dimension_semantics = [#tpu.dimension_semantics<parallel>], iteration_bounds = array<i64: 2>, scalar_prefetch = 0 : i64, scratch_operands = 0 : i64, tpu.core_type = #tpu.core_type<tc>, window_params = [{transform_indices = @transform_0, window_bounds = array<i64: 56, 10>}, {pipeline_mode = #tpu.pipeline_mode<synchronous>, transform_indices = @transform_1, window_bounds = array<i64: 10, 1>}, {pipeline_mode = #tpu.pipeline_mode<synchronous>, transform_indices = @transform_2, window_bounds = array<i64: 1, 1>}, {transform_indices = @transform_3, window_bounds = array<i64: 56, 1>}]} {
    %c0 = arith.constant 0 : index
    %c0_0 = arith.constant 0 : index
    %0 = vector.load %arg1[%c0, %c0_0] : memref<56x10xf32, #tpu.memory_space<vmem>>, vector<56x10xf32>
    %c0_1 = arith.constant 0 : index
    %c0_2 = arith.constant 0 : index
    %1 = vector.load %arg2[%c0_1, %c0_2] : memref<10x1xf32, #tpu.memory_space<vmem>>, vector<10x1xf32>
    %cst = arith.constant dense<0.000000e+00> : vector<56x1xf32>
    %2 = tpu.matmul %0, %1, %cst {dimension_numbers = #tpu.dot_dimension_numbers<[1], [0], [0], [1], [0, 0, 1, 1], [], []>} : vector<56x10xf32>, vector<10x1xf32>, vector<56x1xf32> -> vector<56x1xf32>
    %c0_3 = arith.constant 0 : index
    %c0_4 = arith.constant 0 : index
    %3 = vector.load %arg3[%c0_3, %c0_4] : memref<1x1xf32, #tpu.memory_space<vmem>>, vector<1x1xf32>
    %4 = vector.broadcast %3 : vector<1x1xf32> to vector<56x1xf32>
    %5 = arith.addf %2, %4 : vector<56x1xf32>
    %c0_5 = arith.constant 0 : index
    %c0_6 = arith.constant 0 : index
    %6 = vector.load %arg4[%c0_5, %c0_6] : memref<56x1xf32, #tpu.memory_space<vmem>>, vector<56x1xf32>
    tpu.vector_store %arg4[%c0_5, %c0_6], %5 {strides = array<i32>} : memref<56x1xf32, #tpu.memory_space<vmem>>, vector<56x1xf32>,
    return
  }
  func.func @transform_0(%arg0: i32) -> (i32, i32) {
    %c0_i32 = arith.constant 0 : i32
    %c0_i32_0 = arith.constant 0 : i32
    return %arg0, %c0_i32 : i32, i32
  }
  func.func @transform_1(%arg0: i32) -> (i32, i32) {
    %c0_i32 = arith.constant 0 : i32
    %c0_i32_0 = arith.constant 0 : i32
    %c0_i32_1 = arith.constant 0 : i32
    return %c0_i32, %c0_i32_0 : i32, i32
  }
  func.func @transform_2(%arg0: i32) -> (i32, i32) {
    %c0_i32 = arith.constant 0 : i32
    %c0_i32_0 = arith.constant 0 : i32
    %c0_i32_1 = arith.constant 0 : i32
    return %c0_i32, %c0_i32_0 : i32, i32
  }
  func.func @transform_3(%arg0: i32) -> (i32, i32) {
    %c0_i32 = arith.constant 0 : i32
    %c0_i32_0 = arith.constant 0 : i32
    return %arg0, %c0_i32 : i32, i32
  }
}

</mosaic_0001>

<bundles_post_ra>
// kernel: tpu_custom_call.1
= control target key start
LH: loop header
LB: loop body
LE: loop exit
PB: predicated region body
PF: predicated region fallthrough
CT: control target
= control target key end

     0   :  { %s881_s0 = inlined_call_operand.vmem [shape: f32[100,10], index: 0, kind: input, shape index: {}]   ;;  %s882_s1 = inlined_call_operand.vmem [shape: f32[10,1], index: 1, kind: input, shape index: {}]   ;;  %s883_s2 = inlined_call_operand.<no memory space> [shape: f32[1,1], index: 2, kind: input, shape index: {}]   ;;  %s884_s3 = inlined_call_operand.vmem [shape: f32[100,1], index: 3, kind: output, shape index: {}]  }
   0x1   :  { %v8_v0 = vstv %s883_s2 }
   0x2   :  { %9 = vst [vmem:[#allocation2] sm:$0x1] %v8_v0 }
   0x3   :  { %s761_s14 = smov 0   ;;  %s763_s15 = smov 0  }
   0x4   :  { %s765_s16 = smov 0  }
   0x5 LB: > { %s774_s2 = sadd.s32 4294967295, %s704_s16   ;;  %s776_s17 = sadd.s32 1, %s704_s16   ;;  %s704_s16 = sphi %s765_s16, %s891_s16   ;;  %s700_s15 = sphi %s763_s15, %s890_s15   ;;  %s696_s14 = sphi %s761_s14, %s889_s14  }
   0x6   : > { %s87_s18 = ssub.s32 %s704_s16, %s776_s17  ;;  %s90_s19 = sadd.s32 1, %s700_s15 }
   0x7   : > { %p88_p0 = scmp.eq.s32.totalorder %s87_s18, 0  ;;  %p100_p1 = scmp.ne.s32.totalorder %s700_s15, %s696_s14 }
   0x8   : > { %p101_p2 = scmp.eq.s32.totalorder %s774_s2, 1  ;;  %p524_p3 = scmp.ge.s32.totalorder %s704_s16, 1 }
   0x9   : > { %s784_s20 = scalar_select %p88_p0, %s700_s15, %s90_s19  }
   0xa   : > { %p786_p4 = por %p101_p2, %p100_p1  ;;  %p148_p5 = scmp.lt.s32.totalorder %s704_s16, 3 }
   0xc   : > { %p149_p6 = pnand %p524_p3, %p148_p5 }
   0xd   : > { %s797_s26 = smul.u32 (!%p149_p6), 7, %s774_s2  ;;  %s172_s5 = sand.u32 (!%p149_p6), 1, %s696_s14  }
   0xe   : > { %152 = sbr.rel (%p149_p6) target bundleno = 221 (0xdd), region = 32 }
   0xf   : > { %p180_p7 = scmp.lt.s32.totalorder (!%p149_p6), %s797_s26, 12  ;;  %s553_s6 = smul.u32 (!%p149_p6), 56, %s172_s5 }
  0x11   : > { %s805_s7 = scalar_lea.vmem (!%p149_p6), [#allocation3], %s553_s6  }
  0x13   : > { %v202_v1 = vld [vmem:[%s882_s1 + $0x8] sm:$0x3]  ;;  %vm229_vm0 = vcmask 1041408   ;;  %v201_v2 = vld [vmem:[%s882_s1] sm:$0xff]  ;;  %s181_s27 = scalar_select %p180_p7, %s797_s26, 12  ;;  %vm207_vm1 = vcmask 80896  }
  0x14   : > { %549 = vmatpush.msk.msra.mxu3 %vm229_vm0, %v202_v1  ;;  %526 = vmatpush.msk.msra.mxu0 %vm229_vm0, %v202_v1  ;;  %v643_v10 = vld [vmem:[#allocation2] ss:$0 sm:$0xff]  ;;  %vm271_vm2 = vcmask 7168   ;;  %s287_s8 = ssub.s32 (%p786_p4), 13, %s797_s26  ;;  %s546_s9 = smul.u32 (%p786_p4), 56, %s774_s2 }
  0x15   : > { %547 = vmatpush.msk.msra.mxu1 %vm229_vm0, %v202_v1  ;;  %548 = vmatpush.msk.msra.mxu2 %vm229_vm0, %v202_v1  ;;  %s525_s28 = sshll.u32 %s181_s27, 3  ;;  %p288_p8 = scmp.lt.s32.totalorder (%p786_p4), %s287_s8, 7 }
  0x16   : > { %552 = vmatpush.msra.mxu3 %v201_v2  ;;  %248 = vmatpush.msra.mxu0 %v201_v2  ;;  %s183_s4 = scalar_lea.vmem %s881_s0, %s525_s28  ;;  %s828_s12 = scalar_lea.vmem (%p786_p4), %s884_s3, %s546_s9  }
  0x17   : > { %550 = vmatpush.msra.mxu1 %v201_v2  ;;  %551 = vmatpush.msra.mxu2 %v201_v2  ;;  %v199_v3 = vld [vmem:[%s183_s4 + $0x28] sm:$0xff]  ;;  %v194_v4 = vld [vmem:[%s183_s4] sm:$0xff]  ;;  %v196_v5 = vld [vmem:[%s183_s4 + $0x10] sm:$0xff] }
  0x18   : > { %532 = vmatmul.msk.f32.vlgmr.msra.gmra.mxu3 %vm207_vm1, %v199_v3  ;;  %527 = vmatmul.msk.f32.vlgmr.msra.gmra.mxu0 %vm207_vm1, %v194_v4  ;;  %v198_v6 = vld [vmem:[%s183_s4 + $0x20] sm:$0xff]  ;;  %v200_v7 = vld [vmem:[%s183_s4 + $0x30] sm:$0xff]  ;;  %v195_v8 = vld [vmem:[%s183_s4 + $0x8] sm:$0xff] }
  0x19   : > { %529 = vmatmul.msk.f32.vlgmr.msra.gmra.mxu1 %vm207_vm1, %v196_v5  ;;  %531 = vmatmul.msk.f32.vlgmr.msra.gmra.mxu2 %vm207_vm1, %v198_v6  ;;  %v197_v9 = vld [vmem:[%s183_s4 + $0x18] sm:$0xff] }
  0x20   : > { %533 = vmatmul.msk.f32.gmra.mxu3 %vm207_vm1, %v200_v7  ;;  %528 = vmatmul.msk.f32.gmra.mxu0 %vm207_vm1, %v195_v8 }
  0x21   : > { %530 = vmatmul.msk.f32.gmra.mxu1 %vm207_vm1, %v197_v9 }
  0x95   : > { %v250_v11 = vpop.f32.mrf.mxu0 }
  0x96   : > { %v251_v12 = vadd.f32 %v643_v10, %v250_v11  ;;  %v256_v13 = vpop.f32.mrf.mxu1 }
  0x97   : > { %v257_v14 = vadd.f32 %v643_v10, %v256_v13 }
  0x98   : > { %272 = vst.msk [vmem:[%s805_s7] sm:$0xff] %vm271_vm2, %v251_v12 }
  0x99   : > { %274 = vst.msk [vmem:[%s805_s7 + $0x10] sm:$0xff] %vm271_vm2, %v257_v14 }
  0x9b   : > { %v265_v15 = vpop.f32.mrf.mxu3 }
  0x9c   : > { %v266_v16 = vadd.f32 %v643_v10, %v265_v15  ;;  %v262_v17 = vpop.f32.mrf.mxu2 }
  0x9d   : > { %v253_v18 = vpop.f32.mrf.mxu0  ;;  %v263_v19 = vadd.f32 %v643_v10, %v262_v17 }
  0x9e   : > { %277 = vst.msk [vmem:[%s805_s7 + $0x28] sm:$0xff] %vm271_vm2, %v266_v16  ;;  %v254_v20 = vadd.f32 %v643_v10, %v253_v18  ;;  %v259_v21 = vpop.f32.mrf.mxu1 }
  0x9f   : > { %v260_v22 = vadd.f32 %v643_v10, %v259_v21  ;;  %276 = vst.msk [vmem:[%s805_s7 + $0x20] sm:$0xff] %vm271_vm2, %v263_v19 }
  0xa0   : > { %273 = vst.msk [vmem:[%s805_s7 + $0x8] sm:$0xff] %vm271_vm2, %v254_v20 }
  0xa1   : > { %275 = vst.msk [vmem:[%s805_s7 + $0x18] sm:$0xff] %vm271_vm2, %v260_v22 }
  0xa2   : > { %285 = sbr.rel (!%p786_p4) target bundleno = 221 (0xdd), region = 36 }
  0xa3   : > { %v268_v23 = vpop.f32.mrf.mxu3 }
  0xa4   : > { %v269_v24 = vadd.f32 %v643_v10, %v268_v23 }
  0xa6   : > { %278 = vst.msk [vmem:[%s805_s7 + $0x30] sm:$0xff] %vm271_vm2, %v269_v24 }
  0xa7   : > { %s893_s8 = smov (!%p288_p8, %s287_s8), 7 }
  0xa8   : > { %s534_s13 = sshll.u32 %s893_s8, 3 }
  0xa9   : > { %p537_p9 = scmp.eq.s32.totalorder %s534_s13, 0 }
  0xaa   : > { %644 = sdivrem.u32 (!%p537_p9), %s893_s8, 7 }
  0xab   : > { %296 = sbr.rel (%p537_p9) target bundleno = 221 (0xdd), region = 40 }
  0xb3   : > { %s834_s14 = spop.drf %644 }
  0xb4   : > { %s646_s16 = spop.drf %644  ;;  %p538_p10 = scmp.le.s32.totalorder %s834_s14, 0 }
  0xb5   : > { %s886_s2 = smov (!%p538_p10), %s828_s12  ;;  %s887_s18 = smov (!%p538_p10), %s805_s7 }
  0xb6   : > { %477 = sbr.rel (%p538_p10) target bundleno = 195 (0xc3), region = 116  ;;  %s843_s19 = smov (!%p538_p10), 0  }
  0xb7   : > { %s845_s21 = smov (!%p538_p10), 0  }
  0xbb LB: >> { %v373_v25 = vld [vmem:[%s712_s18] sm:$0xff]  ;;  %v375_v26 = vld [vmem:[%s712_s18 + $0x8] sm:$0xff]  ;;  %v377_v27 = vld [vmem:[%s712_s18 + $0x10] sm:$0xff]  ;;  %s387_s22 = sadd.s32 1, %s716_s19  ;;  %s367_s21 = sadd.s32 1, %s720_s21   ;;  %s720_s21 = sphi %s845_s21, %s367_s21   ;;  %s716_s19 = sphi %s843_s19, %s888_s19   ;;  %s712_s18 = sphi %s887_s18, %s392_s18   ;;  %s708_s2 = sphi %s886_s2, %s393_s2  }
  0xbc   : >> { %374 = vst [vmem:[%s708_s2] sm:$0xff] %v373_v25  ;;  %v379_v28 = vld [vmem:[%s712_s18 + $0x18] sm:$0xff]  ;;  %p388_p11 = scmp.ge.s32.totalorder %s387_s22, %s834_s14  ;;  %v381_v29 = vld [vmem:[%s712_s18 + $0x20] sm:$0xff]  ;;  %v383_v30 = vld [vmem:[%s712_s18 + $0x28] sm:$0xff]  ;;  %p366_p12 = scmp.ge.s32.totalorder %s367_s21, %s834_s14 }
  0xbd   : >> { %376 = vst [vmem:[%s708_s2 + $0x8] sm:$0xff] %v375_v26  ;;  %v385_v31 = vld [vmem:[%s712_s18 + $0x30] sm:$0xff] }
  0xbe   : >> { %378 = vst [vmem:[%s708_s2 + $0x10] sm:$0xff] %v377_v27  ;;  %s895_s22 = smov (%p388_p11, %s387_s22), 0  ;;  %369 = sbr.rel (!%p366_p12) target bundleno = 187 (0xbb), region = 122 }
  0xbf   : >> { %380 = vst [vmem:[%s708_s2 + $0x18] sm:$0xff] %v379_v28  ;;  %s390_s23 = smul.u32 56, %s895_s22  ;;  %s888_s19 = smov %s895_s22 }
  0xc0   : >> { %382 = vst [vmem:[%s708_s2 + $0x20] sm:$0xff] %v381_v29 }
  0xc1   : >> { %384 = vst [vmem:[%s708_s2 + $0x28] sm:$0xff] %v383_v30  ;;  %s392_s18 = scalar_lea.vmem %s805_s7, %s390_s23 [#allocation3]  }
  0xc2   : >> { %386 = vst [vmem:[%s708_s2 + $0x30] sm:$0xff] %v385_v31  ;;  %s393_s2 = scalar_lea.vmem %s828_s12, %s390_s23  }
  0xc3 PF: > { %647 = sdivrem.u32 %s893_s8, 7 }
  0xc4   : > { %s539_s24 = smul.u32 56, %s834_s14 }
  0xc6   : > { %s866_s25 = scalar_lea.vmem %s805_s7, %s539_s24 [#allocation3]   ;;  %s400_s26 = scalar_lea.vmem %s828_s12, %s539_s24  }
  0xcc   : > { %s648_s27 = spop.drf %647 }
  0xcd   : > { %s649_s28 = spop.drf %647 }
  0xce   : > { %p541_p13 = scmp.le.s32.totalorder %s649_s28, 0 }
  0xcf   : > { %s722_s29 = smov (!%p541_p13), %s400_s26   ;;  %s726_s30 = smov (!%p541_p13), %s866_s25  }
  0xd0   : > { %491 = sbr.rel (%p541_p13) target bundleno = 221 (0xdd), region = 127  ;;  %s730_s4 = smov (!%p541_p13), 0  }
  0xd1   : > { %s734_s5 = smov (!%p541_p13), 0  }
  0xd5 LB: >> { %v410_v32 = vld [vmem:[%s728_s30] sm:$0xff]  ;;  %s412_s6 = sadd.s32 1, %s732_s4  ;;  %s404_s5 = sadd.s32 1, %s736_s5   ;;  %s736_s5 = sphi %s734_s5, %s404_s5   ;;  %s732_s4 = sphi %s730_s4, %s731_s4   ;;  %s728_s30 = sphi %s726_s30, %s417_s30   ;;  %s724_s29 = sphi %s722_s29, %s418_s29  }
  0xd6   : >> { %411 = vst [vmem:[%s724_s29] sm:$0xff] %v410_v32  ;;  %p413_p0 = scmp.ge.s32.totalorder %s412_s6, %s649_s28  ;;  %p403_p1 = scmp.ge.s32.totalorder %s404_s5, %s649_s28 }
  0xd8   : >> { %s897_s6 = smov (%p413_p0, %s412_s6), 0  ;;  %406 = sbr.rel (!%p403_p1) target bundleno = 213 (0xd5), region = 133 }
  0xd9   : >> { %s542_s7 = sshll.u32 %s897_s6, 3  ;;  %s731_s4 = smov %s897_s6  }
  0xda   : >> { %s417_s30 = scalar_lea.vmem %s866_s25, %s542_s7 [#allocation3]   ;;  %s418_s29 = scalar_lea.vmem %s400_s26, %s542_s7  }
  0xdd PF: > { %p12_p2 = scmp.ge.s32.totalorder %s776_s17, 4   ;;  %s889_s14 = smov %s700_s15 }
  0xde   : > { %s890_s15 = smov %s784_s20  ;;  %s891_s16 = smov %s776_s17 }
  0xdf   :  { %14 = sbr.rel (!%p12_p2) target bundleno = 5 (0x5), region = 144 }

</bundles_post_ra>
